<compile_context>
chip_gen: v7x
topology: tpu7x:2x2x1
jax: 0.10.0
libtpu: 0.0.40
codegen_flags: <defaults>
</compile_context>

<pallas_src>
import jax
import jax.numpy as jnp
import numpy as np
from jax.experimental import pallas as pl
from jax.experimental.pallas import tpu as pltpu

# Synthetic config (module __init__ shapes)
WORD_NUM = 50
WORD_DIMS = 32          # config.word_dims
LSTM_HIDDENS = 32       # config.lstm_hiddens (total; per direction = 16)
LABEL_NUM = 8           # params.label_num
BATCH = 2
SEQ = 8
H = LSTM_HIDDENS // 2   # per-direction hidden size


def bilstm_fused_kernel(lens_ref, idsf_ref, idsb_ref, ew_ref, bg_ref, whh_ref,
                        wlabf_ref, wlabb_ref, blab_ref, pflip_ref,
                        out_ref, hseq_ref):
    TB, L = out_ref.shape
    H2 = hseq_ref.shape[1]            # 2H (both directions)
    Hd = H2 // 2                      # per-direction hidden
    G8 = whh_ref.shape[1]             # 8H packed gate width (one lane tile)
    W2 = ew_ref.shape[0]              # 2 * vocab (fwd table stacked over bwd table)
    W = W2 // 2
    B = lens_ref.shape[0]
    T = TB // B

    # ---- embedding gather (one-hot) fused with the input projection for BOTH
    #      directions and all T steps in a SINGLE matmul; biases folded.
    widx = jax.lax.broadcasted_iota(jnp.int32, (TB, W2), 1)
    onehot = ((widx == idsf_ref[...]) |
              (widx == (idsb_ref[...] + W))).astype(jnp.float32)   # (T*B, 2W)
    gx = (jnp.dot(onehot, ew_ref[...], preferred_element_type=jnp.float32)
          + bg_ref[...])                                           # (T*B, 8H)

    # ---- packed-sequence masks, hoisted: fwd half compares t, bwd half T-1-t
    t_iota = jax.lax.broadcasted_iota(jnp.int32, (T, B, H2), 0)
    col = jax.lax.broadcasted_iota(jnp.int32, (T, B, H2), 2)
    t_eff = jnp.where(col < Hd, t_iota, (T - 1) - t_iota)
    mask_all = t_eff < lens_ref[...]                               # (T, B, 2H) bool

    # ---- single-tanh nonlinearity constants: sigmoid(x) = 0.5*tanh(x/2) + 0.5
    #      g columns: scale=1, offset=0 (plain tanh); i/f/o columns: scale=0.5,
    #      offset=0.5. Input-scale and output-scale coincide numerically.
    gcol = jax.lax.broadcasted_iota(jnp.int32, (B, G8), 1)
    is_g = (gcol >= 4 * Hd) & (gcol < 6 * Hd)
    scale = jnp.where(is_g, 1.0, 0.5).astype(jnp.float32)
    offset = jnp.where(is_g, 0.0, 0.5).astype(jnp.float32)

    whh = whh_ref[...]                                             # (2H, 8H) block-diag

    h_cat = jnp.zeros((B, H2), jnp.float32)                        # [h_fwd | h_bwd]
    c_cat = jnp.zeros((B, H2), jnp.float32)

    # ---- fused forward+backward recurrence: T serial steps
    for t in range(T):                                             # static, unrolled
        gates = gx[t * B:(t + 1) * B, :] + jnp.dot(
            h_cat, whh, preferred_element_type=jnp.float32)        # (B, 8H)
        acts = jnp.tanh(gates * scale) * scale + offset            # ONE tanh per step
        i = acts[:, 0:2 * Hd]
        f = acts[:, 2 * Hd:4 * Hd]
        g = acts[:, 4 * Hd:6 * Hd]
        o = acts[:, 6 * Hd:8 * Hd]
        c_new = f * c_cat + i * g
        h_new = o * jnp.tanh(c_new)
        m = mask_all[t]                                            # (B, 2H)
        c_cat = jnp.where(m, c_new, c_cat)
        h_cat = jnp.where(m, h_new, h_cat)
        # ONE full-width store per step (fwd half belongs to time t, bwd half to
        # time T-1-t; the bwd time reversal happens once after the loop).
        hseq_ref[t * B:(t + 1) * B, :] = jnp.where(m, h_new, 0.0)

    # ---- hidden2label: split fwd/bwd contributions, flip the bwd one in time
    #      with a tiny precomputed permutation matmul (off the critical path).
    hseq = hseq_ref[...]                                           # (T*B, 2H)
    out_f = jnp.dot(hseq, wlabf_ref[...], preferred_element_type=jnp.float32)
    out_b = jnp.dot(hseq, wlabb_ref[...], preferred_element_type=jnp.float32)
    out_ref[...] = (out_f
                    + jnp.dot(pflip_ref[...], out_b,
                              preferred_element_type=jnp.float32)
                    + blab_ref[...])


def _gate_blocks_T(w, hd):
    """(4H, X) PyTorch gate-stacked weight -> 4 transposed (X, H) blocks (i,f,g,o)."""
    return [w[k * hd:(k + 1) * hd, :].T for k in range(4)]


def lstm_forward(word_v, lengths, P):
    """Weight repacking (gate-major, block-diagonal) + one Pallas kernel call."""
    B, T = word_v.shape
    D = P['embedding'].shape[1]
    L = P['w_lab'].shape[0]
    Hd = P['w_hh_f'].shape[1]
    HI = jax.lax.Precision.HIGHEST

    # Block-diagonal recurrent weight, gate-major columns [i_f i_b f_f f_b g_f g_b o_f o_b]
    whhf = _gate_blocks_T(P['w_hh_f'], Hd)
    whhb = _gate_blocks_T(P['w_hh_b'], Hd)
    zH = jnp.zeros((Hd, Hd), jnp.float32)
    whh_bd = jnp.concatenate([
        jnp.concatenate([whhf[0], zH, whhf[1], zH, whhf[2], zH, whhf[3], zH], axis=1),
        jnp.concatenate([zH, whhb[0], zH, whhb[1], zH, whhb[2], zH, whhb[3]], axis=1),
    ], axis=0)                                               # (2H, 8H)

    # Embedding fused with input projection (weight-only precompute, same gate-major
    # layout); fwd table stacked over bwd table -> one (2W, 8H) table, one matmul.
    wihf = _gate_blocks_T(P['w_ih_f'], Hd)
    wihb = _gate_blocks_T(P['w_ih_b'], Hd)
    zD = jnp.zeros((D, Hd), jnp.float32)
    wihf_exp = jnp.concatenate([wihf[0], zD, wihf[1], zD, wihf[2], zD, wihf[3], zD], axis=1)
    wihb_exp = jnp.concatenate([zD, wihb[0], zD, wihb[1], zD, wihb[2], zD, wihb[3]], axis=1)
    E = P['embedding'].astype(jnp.float32)
    ew = jnp.concatenate([jnp.dot(E, wihf_exp, precision=HI),
                          jnp.dot(E, wihb_exp, precision=HI)], axis=0)   # (2W, 8H)
    # TODO(synk): at production vocab (v7x 64 MiB VMEM) keep `ew` in HBM
    #             (memory_space=pl.ANY) and DMA-gather the needed rows instead.

    bf = (P['b_ih_f'] + P['b_hh_f']).astype(jnp.float32)
    bb = (P['b_ih_b'] + P['b_hh_b']).astype(jnp.float32)
    bg = jnp.concatenate([bf[0:Hd], bb[0:Hd], bf[Hd:2 * Hd], bb[Hd:2 * Hd],
                          bf[2 * Hd:3 * Hd], bb[2 * Hd:3 * Hd],
                          bf[3 * Hd:4 * Hd], bb[3 * Hd:4 * Hd]]).reshape(1, 8 * Hd)

    wlab = P['w_lab'].T.astype(jnp.float32)                  # (2H, L), rows = [fwd | bwd]
    zHL = jnp.zeros((Hd, L), jnp.float32)
    wlab_f = jnp.concatenate([wlab[0:Hd], zHL], axis=0)      # (2H, L), bwd rows zeroed
    wlab_b = jnp.concatenate([zHL, wlab[Hd:2 * Hd]], axis=0) # (2H, L), fwd rows zeroed
    blab = P['b_lab'].reshape(1, L).astype(jnp.float32)

    ids_f = word_v.T.reshape(T * B, 1).astype(jnp.int32)                    # row t*B+b -> word_v[b, t]
    ids_b = jnp.flip(word_v.T, axis=0).reshape(T * B, 1).astype(jnp.int32)  # row t*B+b -> word_v[b, T-1-t]
    lens = lengths.reshape(B, 1).astype(jnp.int32)

    # Time-reversal permutation for the backward-direction label contribution:
    # output row (t, b) takes the bwd product computed at loop row (T-1-t, b).
    rows = np.arange(T * B)
    src = (T - 1 - rows // B) * B + (rows % B)
    pflip = jnp.asarray(np.eye(T * B, dtype=np.float32)[src])               # (T*B, T*B)

    vmem = pl.BlockSpec(memory_space=pltpu.MemorySpace.VMEM)
    out_flat = pl.pallas_call(
        bilstm_fused_kernel,
        out_shape=jax.ShapeDtypeStruct((T * B, L), jnp.float32),
        in_specs=[vmem] * 10,
        out_specs=vmem,
        scratch_shapes=[pltpu.VMEM((T * B, 2 * Hd), jnp.float32)],  # per-step [fwd|bwd] hiddens
        compiler_params=pltpu.CompilerParams(vmem_limit_bytes=32 * 1024 * 1024),
    )(lens, ids_f, ids_b, ew, bg, whh_bd, wlab_f, wlab_b, blab, pflip)
    return out_flat.reshape(T, B, L)


def ref_forward(word_v, lengths, P):
    """Pure-JAX reference (matches PyTorch packed BiLSTM + Linear, eval mode)."""
    emb = jnp.take(P['embedding'], word_v, axis=0)
    x = jnp.transpose(emb, (1, 0, 2))
    T, B, _ = x.shape

    def cell(x_t, h, c, wih, whh, bih, bhh):
        g = x_t @ wih.T + h @ whh.T + bih + bhh
        i = jax.nn.sigmoid(g[:, :H]); f = jax.nn.sigmoid(g[:, H:2 * H])
        gg = jnp.tanh(g[:, 2 * H:3 * H]); o = jax.nn.sigmoid(g[:, 3 * H:])
        c = f * c + i * gg
        return o * jnp.tanh(c), c

    h = jnp.zeros((B, H)); c = jnp.zeros((B, H)); out_f = []
    for t in range(T):
        hn, cn = cell(x[t], h, c, P['w_ih_f'], P['w_hh_f'], P['b_ih_f'], P['b_hh_f'])
        m = (t < lengths)[:, None]
        h = jnp.where(m, hn, h); c = jnp.where(m, cn, c)
        out_f.append(jnp.where(m, hn, 0.0))
    h = jnp.zeros((B, H)); c = jnp.zeros((B, H)); out_b = [None] * T
    for t in range(T - 1, -1, -1):
        hn, cn = cell(x[t], h, c, P['w_ih_b'], P['w_hh_b'], P['b_ih_b'], P['b_hh_b'])
        m = (t < lengths)[:, None]
        h = jnp.where(m, hn, h); c = jnp.where(m, cn, c)
        out_b[t] = jnp.where(m, hn, 0.0)
    hcat = jnp.concatenate([jnp.stack(out_f), jnp.stack(out_b)], axis=-1)  # (T,B,2H)
    return hcat @ P['w_lab'].T + P['b_lab']


if __name__ == "__main__":
    key = jax.random.PRNGKey(0)
    keys = jax.random.split(key, 12)
    b_lstm = 1.0 / np.sqrt(H)
    b_lin = 1.0 / np.sqrt(LSTM_HIDDENS)
    P = {
        'embedding': jax.random.normal(keys[0], (WORD_NUM, WORD_DIMS), jnp.float32),
        'w_ih_f': jax.random.uniform(keys[1], (4 * H, WORD_DIMS), jnp.float32, -b_lstm, b_lstm),
        'w_hh_f': jax.random.uniform(keys[2], (4 * H, H), jnp.float32, -b_lstm, b_lstm),
        'b_ih_f': jax.random.uniform(keys[3], (4 * H,), jnp.float32, -b_lstm, b_lstm),
        'b_hh_f': jax.random.uniform(keys[4], (4 * H,), jnp.float32, -b_lstm, b_lstm),
        'w_ih_b': jax.random.uniform(keys[5], (4 * H, WORD_DIMS), jnp.float32, -b_lstm, b_lstm),
        'w_hh_b': jax.random.uniform(keys[6], (4 * H, H), jnp.float32, -b_lstm, b_lstm),
        'b_ih_b': jax.random.uniform(keys[7], (4 * H,), jnp.float32, -b_lstm, b_lstm),
        'b_hh_b': jax.random.uniform(keys[8], (4 * H,), jnp.float32, -b_lstm, b_lstm),
        'w_lab': jax.random.uniform(keys[9], (LABEL_NUM, LSTM_HIDDENS), jnp.float32, -b_lin, b_lin),
        'b_lab': jax.random.uniform(keys[10], (LABEL_NUM,), jnp.float32, -b_lin, b_lin),
    }
    word_v = jax.random.randint(keys[11], (BATCH, SEQ), 0, WORD_NUM, jnp.int32)
    lengths = jnp.array([SEQ, SEQ - 2], jnp.int32)  # sorted descending (pack_padded requirement)

    out = jax.block_until_ready(jax.jit(lstm_forward)(word_v, lengths, P))
    assert out.shape == (SEQ, BATCH, LABEL_NUM)
    ref = ref_forward(word_v, lengths, P)
    np.testing.assert_allclose(np.asarray(out), np.asarray(ref), rtol=1e-4, atol=1e-4)
    print("KERNEL_OK")
</pallas_src>

<mosaic_0001>
module attributes {stable_mosaic.version = 11 : i64} {
  func.func @bilstm_fused_kernel(%arg0: memref<2x1xi32, #tpu.memory_space<vmem>>, %arg1: memref<16x1xi32, #tpu.memory_space<vmem>>, %arg2: memref<16x1xi32, #tpu.memory_space<vmem>>, %arg3: memref<100x128xf32, #tpu.memory_space<vmem>>, %arg4: memref<1x128xf32, #tpu.memory_space<vmem>>, %arg5: memref<32x128xf32, #tpu.memory_space<vmem>>, %arg6: memref<32x8xf32, #tpu.memory_space<vmem>>, %arg7: memref<32x8xf32, #tpu.memory_space<vmem>>, %arg8: memref<1x8xf32, #tpu.memory_space<vmem>>, %arg9: memref<16x16xf32, #tpu.memory_space<vmem>>, %arg10: memref<16x8xf32, #tpu.memory_space<vmem>>, %arg11: memref<16x32xf32, #tpu.memory_space<vmem>>) attributes {dimension_semantics = [], scalar_prefetch = 0 : i64, scratch_operands = 1 : i64, tpu.core_type = #tpu.core_type<tc>} {
    %0 = tpu.iota {dimensions = array<i32: 1>} : vector<16x100xi32>
    %c0 = arith.constant 0 : index
    %c0_0 = arith.constant 0 : index
    %1 = vector.load %arg1[%c0, %c0_0] : memref<16x1xi32, #tpu.memory_space<vmem>>, vector<16x1xi32>
    %2 = vector.broadcast %1 : vector<16x1xi32> to vector<16x100xi32>
    %3 = arith.cmpi eq, %0, %2 : vector<16x100xi32>
    %c0_1 = arith.constant 0 : index
    %c0_2 = arith.constant 0 : index
    %4 = vector.load %arg2[%c0_1, %c0_2] : memref<16x1xi32, #tpu.memory_space<vmem>>, vector<16x1xi32>
    %c50_i32 = arith.constant 50 : i32
    %5 = vector.broadcast %c50_i32 : i32 to vector<16x1xi32>
    %6 = arith.addi %4, %5 : vector<16x1xi32>
    %7 = vector.broadcast %6 : vector<16x1xi32> to vector<16x100xi32>
    %8 = arith.cmpi eq, %0, %7 : vector<16x100xi32>
    %9 = arith.ori %3, %8 : vector<16x100xi1>
    %10 = arith.extui %9 : vector<16x100xi1> to vector<16x100xi32>
    %11 = arith.sitofp %10 : vector<16x100xi32> to vector<16x100xf32>
    %c0_3 = arith.constant 0 : index
    %c0_4 = arith.constant 0 : index
    %12 = vector.load %arg3[%c0_3, %c0_4] : memref<100x128xf32, #tpu.memory_space<vmem>>, vector<100x128xf32>
    %cst = arith.constant dense<0.000000e+00> : vector<16x128xf32>
    %13 = tpu.matmul %11, %12, %cst {dimension_numbers = #tpu.dot_dimension_numbers<[1], [0], [0], [1], [0, 0, 1, 1], [], []>} : vector<16x100xf32>, vector<100x128xf32>, vector<16x128xf32> -> vector<16x128xf32>
    %c0_5 = arith.constant 0 : index
    %c0_6 = arith.constant 0 : index
    %14 = vector.load %arg4[%c0_5, %c0_6] : memref<1x128xf32, #tpu.memory_space<vmem>>, vector<1x128xf32>
    %15 = vector.broadcast %14 : vector<1x128xf32> to vector<16x128xf32>
    %16 = arith.addf %13, %15 : vector<16x128xf32>
    %17 = tpu.iota {dimensions = array<i32: 0>} : vector<8x2x32xi32>
    %18 = tpu.iota {dimensions = array<i32: 2>} : vector<8x2x32xi32>
    %c16_i32 = arith.constant 16 : i32
    %19 = vector.broadcast %c16_i32 : i32 to vector<8x2x32xi32>
    %20 = arith.cmpi slt, %18, %19 : vector<8x2x32xi32>
    %c7_i32 = arith.constant 7 : i32
    %21 = vector.broadcast %c7_i32 : i32 to vector<8x2x32xi32>
    %22 = arith.subi %21, %17 : vector<8x2x32xi32>
    %23 = arith.select %20, %17, %22 : vector<8x2x32xi1>, vector<8x2x32xi32>
    %c0_7 = arith.constant 0 : index
    %c0_8 = arith.constant 0 : index
    %24 = vector.load %arg0[%c0_7, %c0_8] : memref<2x1xi32, #tpu.memory_space<vmem>>, vector<2x1xi32>
    %25 = vector.shape_cast %24 : vector<2x1xi32> to vector<1x2x1xi32>
    %26 = vector.broadcast %25 : vector<1x2x1xi32> to vector<8x2x32xi32>
    %27 = arith.cmpi slt, %23, %26 : vector<8x2x32xi32>
    %28 = tpu.iota {dimensions = array<i32: 1>} : vector<2x128xi32>
    %c64_i32 = arith.constant 64 : i32
    %29 = vector.broadcast %c64_i32 : i32 to vector<2x128xi32>
    %30 = arith.cmpi sge, %28, %29 : vector<2x128xi32>
    %c96_i32 = arith.constant 96 : i32
    %31 = vector.broadcast %c96_i32 : i32 to vector<2x128xi32>
    %32 = arith.cmpi slt, %28, %31 : vector<2x128xi32>
    %33 = arith.andi %30, %32 : vector<2x128xi1>
    %cst_9 = arith.constant 1.000000e+00 : f32
    %cst_10 = arith.constant 5.000000e-01 : f32
    %34 = vector.broadcast %cst_9 : f32 to vector<2x128xf32>
    %35 = vector.broadcast %cst_10 : f32 to vector<2x128xf32>
    %36 = arith.select %33, %34, %35 : vector<2x128xi1>, vector<2x128xf32>
    %cst_11 = arith.constant 0.000000e+00 : f32
    %cst_12 = arith.constant 5.000000e-01 : f32
    %37 = vector.broadcast %cst_11 : f32 to vector<2x128xf32>
    %38 = vector.broadcast %cst_12 : f32 to vector<2x128xf32>
    %39 = arith.select %33, %37, %38 : vector<2x128xi1>, vector<2x128xf32>
    %c0_13 = arith.constant 0 : index
    %c0_14 = arith.constant 0 : index
    %40 = vector.load %arg5[%c0_13, %c0_14] : memref<32x128xf32, #tpu.memory_space<vmem>>, vector<32x128xf32>
    %cst_15 = arith.constant 0.000000e+00 : f32
    %41 = vector.broadcast %cst_15 : f32 to vector<2x32xf32>
    %cst_16 = arith.constant 0.000000e+00 : f32
    %42 = vector.broadcast %cst_16 : f32 to vector<2x32xf32>
    %43 = vector.extract_strided_slice %16 {offsets = [0, 0], sizes = [2, 128], strides = [1, 1]} : vector<16x128xf32> to vector<2x128xf32>
    %cst_17 = arith.constant dense<0.000000e+00> : vector<2x128xf32>
    %44 = tpu.matmul %41, %40, %cst_17 {dimension_numbers = #tpu.dot_dimension_numbers<[1], [0], [0], [1], [0, 0, 1, 1], [], []>} : vector<2x32xf32>, vector<32x128xf32>, vector<2x128xf32> -> vector<2x128xf32>
    %45 = arith.addf %43, %44 : vector<2x128xf32>
    %46 = arith.mulf %45, %36 : vector<2x128xf32>
    %47 = math.tanh %46 : vector<2x128xf32>
    %48 = arith.mulf %47, %36 : vector<2x128xf32>
    %49 = arith.addf %48, %39 : vector<2x128xf32>
    %50 = vector.extract_strided_slice %49 {offsets = [0, 0], sizes = [2, 32], strides = [1, 1]} : vector<2x128xf32> to vector<2x32xf32>
    %51 = vector.extract_strided_slice %49 {offsets = [0, 32], sizes = [2, 32], strides = [1, 1]} : vector<2x128xf32> to vector<2x32xf32>
    %52 = vector.extract_strided_slice %49 {offsets = [0, 64], sizes = [2, 32], strides = [1, 1]} : vector<2x128xf32> to vector<2x32xf32>
    %53 = vector.extract_strided_slice %49 {offsets = [0, 96], sizes = [2, 32], strides = [1, 1]} : vector<2x128xf32> to vector<2x32xf32>
    %54 = arith.mulf %51, %42 : vector<2x32xf32>
    %55 = arith.mulf %50, %52 : vector<2x32xf32>
    %56 = arith.addf %54, %55 : vector<2x32xf32>
    %57 = math.tanh %56 : vector<2x32xf32>
    %58 = arith.mulf %53, %57 : vector<2x32xf32>
    %59 = vector.extract_strided_slice %27 {offsets = [0, 0, 0], sizes = [1, 2, 32], strides = [1, 1, 1]} : vector<8x2x32xi1> to vector<1x2x32xi1>
    %60 = vector.shape_cast %59 : vector<1x2x32xi1> to vector<2x32xi1>
    %61 = arith.select %60, %56, %42 : vector<2x32xi1>, vector<2x32xf32>
    %62 = arith.select %60, %58, %41 : vector<2x32xi1>, vector<2x32xf32>
    %cst_18 = arith.constant 0.000000e+00 : f32
    %63 = vector.broadcast %cst_18 : f32 to vector<2x32xf32>
    %64 = arith.select %60, %58, %63 : vector<2x32xi1>, vector<2x32xf32>
    %c0_19 = arith.constant 0 : index
    %c0_20 = arith.constant 0 : index
    %65 = vector.load %arg11[%c0_19, %c0_20] : memref<16x32xf32, #tpu.memory_space<vmem>>, vector<2x32xf32>
    tpu.vector_store %arg11[%c0_19, %c0_20], %64 {strides = array<i32>} : memref<16x32xf32, #tpu.memory_space<vmem>>, vector<2x32xf32>,
    %66 = vector.extract_strided_slice %16 {offsets = [2, 0], sizes = [2, 128], strides = [1, 1]} : vector<16x128xf32> to vector<2x128xf32>
    %cst_21 = arith.constant dense<0.000000e+00> : vector<2x128xf32>
    %67 = tpu.matmul %62, %40, %cst_21 {dimension_numbers = #tpu.dot_dimension_numbers<[1], [0], [0], [1], [0, 0, 1, 1], [], []>} : vector<2x32xf32>, vector<32x128xf32>, vector<2x128xf32> -> vector<2x128xf32>
    %68 = arith.addf %66, %67 : vector<2x128xf32>
    %69 = arith.mulf %68, %36 : vector<2x128xf32>
    %70 = math.tanh %69 : vector<2x128xf32>
    %71 = arith.mulf %70, %36 : vector<2x128xf32>
    %72 = arith.addf %71, %39 : vector<2x128xf32>
    %73 = vector.extract_strided_slice %72 {offsets = [0, 0], sizes = [2, 32], strides = [1, 1]} : vector<2x128xf32> to vector<2x32xf32>
    %74 = vector.extract_strided_slice %72 {offsets = [0, 32], sizes = [2, 32], strides = [1, 1]} : vector<2x128xf32> to vector<2x32xf32>
    %75 = vector.extract_strided_slice %72 {offsets = [0, 64], sizes = [2, 32], strides = [1, 1]} : vector<2x128xf32> to vector<2x32xf32>
    %76 = vector.extract_strided_slice %72 {offsets = [0, 96], sizes = [2, 32], strides = [1, 1]} : vector<2x128xf32> to vector<2x32xf32>
    %77 = arith.mulf %74, %61 : vector<2x32xf32>
    %78 = arith.mulf %73, %75 : vector<2x32xf32>
    %79 = arith.addf %77, %78 : vector<2x32xf32>
    %80 = math.tanh %79 : vector<2x32xf32>
    %81 = arith.mulf %76, %80 : vector<2x32xf32>
    %82 = vector.extract_strided_slice %27 {offsets = [1, 0, 0], sizes = [1, 2, 32], strides = [1, 1, 1]} : vector<8x2x32xi1> to vector<1x2x32xi1>
    %83 = vector.shape_cast %82 : vector<1x2x32xi1> to vector<2x32xi1>
    %84 = arith.select %83, %79, %61 : vector<2x32xi1>, vector<2x32xf32>
    %85 = arith.select %83, %81, %62 : vector<2x32xi1>, vector<2x32xf32>
    %cst_22 = arith.constant 0.000000e+00 : f32
    %86 = vector.broadcast %cst_22 : f32 to vector<2x32xf32>
    %87 = arith.select %83, %81, %86 : vector<2x32xi1>, vector<2x32xf32>
    %c2 = arith.constant 2 : index
    %c0_23 = arith.constant 0 : index
    %88 = vector.load %arg11[%c2, %c0_23] : memref<16x32xf32, #tpu.memory_space<vmem>>, vector<2x32xf32>
    tpu.vector_store %arg11[%c2, %c0_23], %87 {strides = array<i32>} : memref<16x32xf32, #tpu.memory_space<vmem>>, vector<2x32xf32>,
    %89 = vector.extract_strided_slice %16 {offsets = [4, 0], sizes = [2, 128], strides = [1, 1]} : vector<16x128xf32> to vector<2x128xf32>
    %cst_24 = arith.constant dense<0.000000e+00> : vector<2x128xf32>
    %90 = tpu.matmul %85, %40, %cst_24 {dimension_numbers = #tpu.dot_dimension_numbers<[1], [0], [0], [1], [0, 0, 1, 1], [], []>} : vector<2x32xf32>, vector<32x128xf32>, vector<2x128xf32> -> vector<2x128xf32>
    %91 = arith.addf %89, %90 : vector<2x128xf32>
    %92 = arith.mulf %91, %36 : vector<2x128xf32>
    %93 = math.tanh %92 : vector<2x128xf32>
    %94 = arith.mulf %93, %36 : vector<2x128xf32>
    %95 = arith.addf %94, %39 : vector<2x128xf32>
    %96 = vector.extract_strided_slice %95 {offsets = [0, 0], sizes = [2, 32], strides = [1, 1]} : vector<2x128xf32> to vector<2x32xf32>
    %97 = vector.extract_strided_slice %95 {offsets = [0, 32], sizes = [2, 32], strides = [1, 1]} : vector<2x128xf32> to vector<2x32xf32>
    %98 = vector.extract_strided_slice %95 {offsets = [0, 64], sizes = [2, 32], strides = [1, 1]} : vector<2x128xf32> to vector<2x32xf32>
    %99 = vector.extract_strided_slice %95 {offsets = [0, 96], sizes = [2, 32], strides = [1, 1]} : vector<2x128xf32> to vector<2x32xf32>
    %100 = arith.mulf %97, %84 : vector<2x32xf32>
    %101 = arith.mulf %96, %98 : vector<2x32xf32>
    %102 = arith.addf %100, %101 : vector<2x32xf32>
    %103 = math.tanh %102 : vector<2x32xf32>
    %104 = arith.mulf %99, %103 : vector<2x32xf32>
    %105 = vector.extract_strided_slice %27 {offsets = [2, 0, 0], sizes = [1, 2, 32], strides = [1, 1, 1]} : vector<8x2x32xi1> to vector<1x2x32xi1>
    %106 = vector.shape_cast %105 : vector<1x2x32xi1> to vector<2x32xi1>
    %107 = arith.select %106, %102, %84 : vector<2x32xi1>, vector<2x32xf32>
    %108 = arith.select %106, %104, %85 : vector<2x32xi1>, vector<2x32xf32>
    %cst_25 = arith.constant 0.000000e+00 : f32
    %109 = vector.broadcast %cst_25 : f32 to vector<2x32xf32>
    %110 = arith.select %106, %104, %109 : vector<2x32xi1>, vector<2x32xf32>
    %c4 = arith.constant 4 : index
    %c0_26 = arith.constant 0 : index
    %111 = vector.load %arg11[%c4, %c0_26] : memref<16x32xf32, #tpu.memory_space<vmem>>, vector<2x32xf32>
    tpu.vector_store %arg11[%c4, %c0_26], %110 {strides = array<i32>} : memref<16x32xf32, #tpu.memory_space<vmem>>, vector<2x32xf32>,
    %112 = vector.extract_strided_slice %16 {offsets = [6, 0], sizes = [2, 128], strides = [1, 1]} : vector<16x128xf32> to vector<2x128xf32>
    %cst_27 = arith.constant dense<0.000000e+00> : vector<2x128xf32>
    %113 = tpu.matmul %108, %40, %cst_27 {dimension_numbers = #tpu.dot_dimension_numbers<[1], [0], [0], [1], [0, 0, 1, 1], [], []>} : vector<2x32xf32>, vector<32x128xf32>, vector<2x128xf32> -> vector<2x128xf32>
    %114 = arith.addf %112, %113 : vector<2x128xf32>
    %115 = arith.mulf %114, %36 : vector<2x128xf32>
    %116 = math.tanh %115 : vector<2x128xf32>
    %117 = arith.mulf %116, %36 : vector<2x128xf32>
    %118 = arith.addf %117, %39 : vector<2x128xf32>
    %119 = vector.extract_strided_slice %118 {offsets = [0, 0], sizes = [2, 32], strides = [1, 1]} : vector<2x128xf32> to vector<2x32xf32>
    %120 = vector.extract_strided_slice %118 {offsets = [0, 32], sizes = [2, 32], strides = [1, 1]} : vector<2x128xf32> to vector<2x32xf32>
    %121 = vector.extract_strided_slice %118 {offsets = [0, 64], sizes = [2, 32], strides = [1, 1]} : vector<2x128xf32> to vector<2x32xf32>
    %122 = vector.extract_strided_slice %118 {offsets = [0, 96], sizes = [2, 32], strides = [1, 1]} : vector<2x128xf32> to vector<2x32xf32>
    %123 = arith.mulf %120, %107 : vector<2x32xf32>
    %124 = arith.mulf %119, %121 : vector<2x32xf32>
    %125 = arith.addf %123, %124 : vector<2x32xf32>
    %126 = math.tanh %125 : vector<2x32xf32>
    %127 = arith.mulf %122, %126 : vector<2x32xf32>
    %128 = vector.extract_strided_slice %27 {offsets = [3, 0, 0], sizes = [1, 2, 32], strides = [1, 1, 1]} : vector<8x2x32xi1> to vector<1x2x32xi1>
    %129 = vector.shape_cast %128 : vector<1x2x32xi1> to vector<2x32xi1>
    %130 = arith.select %129, %125, %107 : vector<2x32xi1>, vector<2x32xf32>
    %131 = arith.select %129, %127, %108 : vector<2x32xi1>, vector<2x32xf32>
    %cst_28 = arith.constant 0.000000e+00 : f32
    %132 = vector.broadcast %cst_28 : f32 to vector<2x32xf32>
    %133 = arith.select %129, %127, %132 : vector<2x32xi1>, vector<2x32xf32>
    %c6 = arith.constant 6 : index
    %c0_29 = arith.constant 0 : index
    %134 = vector.load %arg11[%c6, %c0_29] : memref<16x32xf32, #tpu.memory_space<vmem>>, vector<2x32xf32>
    tpu.vector_store %arg11[%c6, %c0_29], %133 {strides = array<i32>} : memref<16x32xf32, #tpu.memory_space<vmem>>, vector<2x32xf32>,
    %135 = vector.extract_strided_slice %16 {offsets = [8, 0], sizes = [2, 128], strides = [1, 1]} : vector<16x128xf32> to vector<2x128xf32>
    %cst_30 = arith.constant dense<0.000000e+00> : vector<2x128xf32>
    %136 = tpu.matmul %131, %40, %cst_30 {dimension_numbers = #tpu.dot_dimension_numbers<[1], [0], [0], [1], [0, 0, 1, 1], [], []>} : vector<2x32xf32>, vector<32x128xf32>, vector<2x128xf32> -> vector<2x128xf32>
    %137 = arith.addf %135, %136 : vector<2x128xf32>
    %138 = arith.mulf %137, %36 : vector<2x128xf32>
    %139 = math.tanh %138 : vector<2x128xf32>
    %140 = arith.mulf %139, %36 : vector<2x128xf32>
    %141 = arith.addf %140, %39 : vector<2x128xf32>
    %142 = vector.extract_strided_slice %141 {offsets = [0, 0], sizes = [2, 32], strides = [1, 1]} : vector<2x128xf32> to vector<2x32xf32>
    %143 = vector.extract_strided_slice %141 {offsets = [0, 32], sizes = [2, 32], strides = [1, 1]} : vector<2x128xf32> to vector<2x32xf32>
    %144 = vector.extract_strided_slice %141 {offsets = [0, 64], sizes = [2, 32], strides = [1, 1]} : vector<2x128xf32> to vector<2x32xf32>
    %145 = vector.extract_strided_slice %141 {offsets = [0, 96], sizes = [2, 32], strides = [1, 1]} : vector<2x128xf32> to vector<2x32xf32>
    %146 = arith.mulf %143, %130 : vector<2x32xf32>
    %147 = arith.mulf %142, %144 : vector<2x32xf32>
    %148 = arith.addf %146, %147 : vector<2x32xf32>
    %149 = math.tanh %148 : vector<2x32xf32>
    %150 = arith.mulf %145, %149 : vector<2x32xf32>
    %151 = vector.extract_strided_slice %27 {offsets = [4, 0, 0], sizes = [1, 2, 32], strides = [1, 1, 1]} : vector<8x2x32xi1> to vector<1x2x32xi1>
    %152 = vector.shape_cast %151 : vector<1x2x32xi1> to vector<2x32xi1>
    %153 = arith.select %152, %148, %130 : vector<2x32xi1>, vector<2x32xf32>
    %154 = arith.select %152, %150, %131 : vector<2x32xi1>, vector<2x32xf32>
    %cst_31 = arith.constant 0.000000e+00 : f32
    %155 = vector.broadcast %cst_31 : f32 to vector<2x32xf32>
    %156 = arith.select %152, %150, %155 : vector<2x32xi1>, vector<2x32xf32>
    %c8 = arith.constant 8 : index
    %c0_32 = arith.constant 0 : index
    %157 = vector.load %arg11[%c8, %c0_32] : memref<16x32xf32, #tpu.memory_space<vmem>>, vector<2x32xf32>
    tpu.vector_store %arg11[%c8, %c0_32], %156 {strides = array<i32>} : memref<16x32xf32, #tpu.memory_space<vmem>>, vector<2x32xf32>,
    %158 = vector.extract_strided_slice %16 {offsets = [10, 0], sizes = [2, 128], strides = [1, 1]} : vector<16x128xf32> to vector<2x128xf32>
    %cst_33 = arith.constant dense<0.000000e+00> : vector<2x128xf32>
    %159 = tpu.matmul %154, %40, %cst_33 {dimension_numbers = #tpu.dot_dimension_numbers<[1], [0], [0], [1], [0, 0, 1, 1], [], []>} : vector<2x32xf32>, vector<32x128xf32>, vector<2x128xf32> -> vector<2x128xf32>
    %160 = arith.addf %158, %159 : vector<2x128xf32>
    %161 = arith.mulf %160, %36 : vector<2x128xf32>
    %162 = math.tanh %161 : vector<2x128xf32>
    %163 = arith.mulf %162, %36 : vector<2x128xf32>
    %164 = arith.addf %163, %39 : vector<2x128xf32>
    %165 = vector.extract_strided_slice %164 {offsets = [0, 0], sizes = [2, 32], strides = [1, 1]} : vector<2x128xf32> to vector<2x32xf32>
    %166 = vector.extract_strided_slice %164 {offsets = [0, 32], sizes = [2, 32], strides = [1, 1]} : vector<2x128xf32> to vector<2x32xf32>
    %167 = vector.extract_strided_slice %164 {offsets = [0, 64], sizes = [2, 32], strides = [1, 1]} : vector<2x128xf32> to vector<2x32xf32>
    %168 = vector.extract_strided_slice %164 {offsets = [0, 96], sizes = [2, 32], strides = [1, 1]} : vector<2x128xf32> to vector<2x32xf32>
    %169 = arith.mulf %166, %153 : vector<2x32xf32>
    %170 = arith.mulf %165, %167 : vector<2x32xf32>
    %171 = arith.addf %169, %170 : vector<2x32xf32>
    %172 = math.tanh %171 : vector<2x32xf32>
    %173 = arith.mulf %168, %172 : vector<2x32xf32>
    %174 = vector.extract_strided_slice %27 {offsets = [5, 0, 0], sizes = [1, 2, 32], strides = [1, 1, 1]} : vector<8x2x32xi1> to vector<1x2x32xi1>
    %175 = vector.shape_cast %174 : vector<1x2x32xi1> to vector<2x32xi1>
    %176 = arith.select %175, %171, %153 : vector<2x32xi1>, vector<2x32xf32>
    %177 = arith.select %175, %173, %154 : vector<2x32xi1>, vector<2x32xf32>
    %cst_34 = arith.constant 0.000000e+00 : f32
    %178 = vector.broadcast %cst_34 : f32 to vector<2x32xf32>
    %179 = arith.select %175, %173, %178 : vector<2x32xi1>, vector<2x32xf32>
    %c10 = arith.constant 10 : index
    %c0_35 = arith.constant 0 : index
    %180 = vector.load %arg11[%c10, %c0_35] : memref<16x32xf32, #tpu.memory_space<vmem>>, vector<2x32xf32>
    tpu.vector_store %arg11[%c10, %c0_35], %179 {strides = array<i32>} : memref<16x32xf32, #tpu.memory_space<vmem>>, vector<2x32xf32>,
    %181 = vector.extract_strided_slice %16 {offsets = [12, 0], sizes = [2, 128], strides = [1, 1]} : vector<16x128xf32> to vector<2x128xf32>
    %cst_36 = arith.constant dense<0.000000e+00> : vector<2x128xf32>
    %182 = tpu.matmul %177, %40, %cst_36 {dimension_numbers = #tpu.dot_dimension_numbers<[1], [0], [0], [1], [0, 0, 1, 1], [], []>} : vector<2x32xf32>, vector<32x128xf32>, vector<2x128xf32> -> vector<2x128xf32>
    %183 = arith.addf %181, %182 : vector<2x128xf32>
    %184 = arith.mulf %183, %36 : vector<2x128xf32>
    %185 = math.tanh %184 : vector<2x128xf32>
    %186 = arith.mulf %185, %36 : vector<2x128xf32>
    %187 = arith.addf %186, %39 : vector<2x128xf32>
    %188 = vector.extract_strided_slice %187 {offsets = [0, 0], sizes = [2, 32], strides = [1, 1]} : vector<2x128xf32> to vector<2x32xf32>
    %189 = vector.extract_strided_slice %187 {offsets = [0, 32], sizes = [2, 32], strides = [1, 1]} : vector<2x128xf32> to vector<2x32xf32>
    %190 = vector.extract_strided_slice %187 {offsets = [0, 64], sizes = [2, 32], strides = [1, 1]} : vector<2x128xf32> to vector<2x32xf32>
    %191 = vector.extract_strided_slice %187 {offsets = [0, 96], sizes = [2, 32], strides = [1, 1]} : vector<2x128xf32> to vector<2x32xf32>
    %192 = arith.mulf %189, %176 : vector<2x32xf32>
    %193 = arith.mulf %188, %190 : vector<2x32xf32>
    %194 = arith.addf %192, %193 : vector<2x32xf32>
    %195 = math.tanh %194 : vector<2x32xf32>
    %196 = arith.mulf %191, %195 : vector<2x32xf32>
    %197 = vector.extract_strided_slice %27 {offsets = [6, 0, 0], sizes = [1, 2, 32], strides = [1, 1, 1]} : vector<8x2x32xi1> to vector<1x2x32xi1>
    %198 = vector.shape_cast %197 : vector<1x2x32xi1> to vector<2x32xi1>
    %199 = arith.select %198, %194, %176 : vector<2x32xi1>, vector<2x32xf32>
    %200 = arith.select %198, %196, %177 : vector<2x32xi1>, vector<2x32xf32>
    %cst_37 = arith.constant 0.000000e+00 : f32
    %201 = vector.broadcast %cst_37 : f32 to vector<2x32xf32>
    %202 = arith.select %198, %196, %201 : vector<2x32xi1>, vector<2x32xf32>
    %c12 = arith.constant 12 : index
    %c0_38 = arith.constant 0 : index
    %203 = vector.load %arg11[%c12, %c0_38] : memref<16x32xf32, #tpu.memory_space<vmem>>, vector<2x32xf32>
    tpu.vector_store %arg11[%c12, %c0_38], %202 {strides = array<i32>} : memref<16x32xf32, #tpu.memory_space<vmem>>, vector<2x32xf32>,
    %204 = vector.extract_strided_slice %16 {offsets = [14, 0], sizes = [2, 128], strides = [1, 1]} : vector<16x128xf32> to vector<2x128xf32>
    %cst_39 = arith.constant dense<0.000000e+00> : vector<2x128xf32>
    %205 = tpu.matmul %200, %40, %cst_39 {dimension_numbers = #tpu.dot_dimension_numbers<[1], [0], [0], [1], [0, 0, 1, 1], [], []>} : vector<2x32xf32>, vector<32x128xf32>, vector<2x128xf32> -> vector<2x128xf32>
    %206 = arith.addf %204, %205 : vector<2x128xf32>
    %207 = arith.mulf %206, %36 : vector<2x128xf32>
    %208 = math.tanh %207 : vector<2x128xf32>
    %209 = arith.mulf %208, %36 : vector<2x128xf32>
    %210 = arith.addf %209, %39 : vector<2x128xf32>
    %211 = vector.extract_strided_slice %210 {offsets = [0, 0], sizes = [2, 32], strides = [1, 1]} : vector<2x128xf32> to vector<2x32xf32>
    %212 = vector.extract_strided_slice %210 {offsets = [0, 32], sizes = [2, 32], strides = [1, 1]} : vector<2x128xf32> to vector<2x32xf32>
    %213 = vector.extract_strided_slice %210 {offsets = [0, 64], sizes = [2, 32], strides = [1, 1]} : vector<2x128xf32> to vector<2x32xf32>
    %214 = vector.extract_strided_slice %210 {offsets = [0, 96], sizes = [2, 32], strides = [1, 1]} : vector<2x128xf32> to vector<2x32xf32>
    %215 = arith.mulf %212, %199 : vector<2x32xf32>
    %216 = arith.mulf %211, %213 : vector<2x32xf32>
    %217 = arith.addf %215, %216 : vector<2x32xf32>
    %218 = math.tanh %217 : vector<2x32xf32>
    %219 = arith.mulf %214, %218 : vector<2x32xf32>
    %220 = vector.extract_strided_slice %27 {offsets = [7, 0, 0], sizes = [1, 2, 32], strides = [1, 1, 1]} : vector<8x2x32xi1> to vector<1x2x32xi1>
    %221 = vector.shape_cast %220 : vector<1x2x32xi1> to vector<2x32xi1>
    %cst_40 = arith.constant 0.000000e+00 : f32
    %222 = vector.broadcast %cst_40 : f32 to vector<2x32xf32>
    %223 = arith.select %221, %219, %222 : vector<2x32xi1>, vector<2x32xf32>
    %c14 = arith.constant 14 : index
    %c0_41 = arith.constant 0 : index
    %224 = vector.load %arg11[%c14, %c0_41] : memref<16x32xf32, #tpu.memory_space<vmem>>, vector<2x32xf32>
    tpu.vector_store %arg11[%c14, %c0_41], %223 {strides = array<i32>} : memref<16x32xf32, #tpu.memory_space<vmem>>, vector<2x32xf32>,
    %c0_42 = arith.constant 0 : index
    %c0_43 = arith.constant 0 : index
    %225 = vector.load %arg11[%c0_42, %c0_43] : memref<16x32xf32, #tpu.memory_space<vmem>>, vector<16x32xf32>
    %c0_44 = arith.constant 0 : index
    %c0_45 = arith.constant 0 : index
    %226 = vector.load %arg6[%c0_44, %c0_45] : memref<32x8xf32, #tpu.memory_space<vmem>>, vector<32x8xf32>
    %cst_46 = arith.constant dense<0.000000e+00> : vector<16x8xf32>
    %227 = tpu.matmul %225, %226, %cst_46 {dimension_numbers = #tpu.dot_dimension_numbers<[1], [0], [0], [1], [0, 0, 1, 1], [], []>} : vector<16x32xf32>, vector<32x8xf32>, vector<16x8xf32> -> vector<16x8xf32>
    %c0_47 = arith.constant 0 : index
    %c0_48 = arith.constant 0 : index
    %228 = vector.load %arg7[%c0_47, %c0_48] : memref<32x8xf32, #tpu.memory_space<vmem>>, vector<32x8xf32>
    %cst_49 = arith.constant dense<0.000000e+00> : vector<16x8xf32>
    %229 = tpu.matmul %225, %228, %cst_49 {dimension_numbers = #tpu.dot_dimension_numbers<[1], [0], [0], [1], [0, 0, 1, 1], [], []>} : vector<16x32xf32>, vector<32x8xf32>, vector<16x8xf32> -> vector<16x8xf32>
    %c0_50 = arith.constant 0 : index
    %c0_51 = arith.constant 0 : index
    %230 = vector.load %arg9[%c0_50, %c0_51] : memref<16x16xf32, #tpu.memory_space<vmem>>, vector<16x16xf32>
    %cst_52 = arith.constant dense<0.000000e+00> : vector<16x8xf32>
    %231 = tpu.matmul %230, %229, %cst_52 {dimension_numbers = #tpu.dot_dimension_numbers<[1], [0], [0], [1], [0, 0, 1, 1], [], []>} : vector<16x16xf32>, vector<16x8xf32>, vector<16x8xf32> -> vector<16x8xf32>
    %232 = arith.addf %227, %231 : vector<16x8xf32>
    %c0_53 = arith.constant 0 : index
    %c0_54 = arith.constant 0 : index
    %233 = vector.load %arg8[%c0_53, %c0_54] : memref<1x8xf32, #tpu.memory_space<vmem>>, vector<1x8xf32>
    %234 = vector.broadcast %233 : vector<1x8xf32> to vector<16x8xf32>
    %235 = arith.addf %232, %234 : vector<16x8xf32>
    %c0_55 = arith.constant 0 : index
    %c0_56 = arith.constant 0 : index
    %236 = vector.load %arg10[%c0_55, %c0_56] : memref<16x8xf32, #tpu.memory_space<vmem>>, vector<16x8xf32>
    tpu.vector_store %arg10[%c0_55, %c0_56], %235 {strides = array<i32>} : memref<16x8xf32, #tpu.memory_space<vmem>>, vector<16x8xf32>,
    return
  }
}

</mosaic_0001>

<bundles_post_ra>
// kernel: lstm_forward.1
= control target key start
LH: loop header
LB: loop body
LE: loop exit
PB: predicated region body
PF: predicated region fallthrough
CT: control target
= control target key end

     0   :  { %v1801_v3 = vmov 0   ;;  %v1802_v15 = vmov 0.0|0.0   ;;  %s2186_s0 = inlined_call_operand.vmem [shape: s32[2,1], index: 0, kind: input, shape index: {}]   ;;  %s2187_s1 = inlined_call_operand.vmem [shape: s32[16,1], index: 1, kind: input, shape index: {}]   ;;  %s2188_s2 = inlined_call_operand.vmem [shape: s32[16,1], index: 2, kind: input, shape index: {}]   ;;  %s2189_s3 = inlined_call_operand.vmem [shape: f32[100,128], index: 3, kind: input, shape index: {}]   ;;  %s2190_s4 = inlined_call_operand.vmem [shape: f32[1,128], index: 4, kind: input, shape index: {}]   ;;  %s2191_s5 = inlined_call_operand.vmem [shape: f32[32,128], index: 5, kind: input, shape index: {}]   ;;  %s2192_s6 = inlined_call_operand.vmem [shape: f32[32,8], index: 6, kind: input, shape index: {}]   ;;  %s2193_s7 = inlined_call_operand.vmem [shape: f32[32,8], index: 7, kind: input, shape index: {}]   ;;  %s2194_s8 = inlined_call_operand.vmem [shape: f32[1,8], index: 8, kind: input, shape index: {}]   ;;  %s2195_s9 = inlined_call_operand.vmem [shape: f32[16,16], index: 9, kind: input, shape index: {}]   ;;  %s2196_s10 = inlined_call_operand.hbm [shape: f32[16,8], index: 10, kind: output, shape index: {}]  }
   0x1   :  { %v39_v0 = vld [vmem:[%s2187_s1 + $0x8] sm:$0xff]  ;;  %v38_v1 = vld [vmem:[%s2187_s1] sm:$0xff]  ;;  %1744 = vset.pattern.permute.xlu1 %v1801_v3  ;;  %1743 = vset.pattern.permute.xlu0 %v1801_v3  ;;  %v68_v10 = vld [vmem:[%s2189_s3 + $0x10] sm:$0xff] }
   0x2   :  { %v49_v2 = vld [vmem:[%s2188_s2 + $0x8] sm:$0xff]  ;;  %v48_v4 = vld [vmem:[%s2188_s2] sm:$0xff]  ;;  %44 = vperm.xlu1 %1744, %v39_v0   ;;  %41 = vperm.xlu0 %1743, %v38_v1   ;;  %v69_v11 = vld [vmem:[%s2189_s3 + $0x18] sm:$0xff] }
   0x3   :  { %v66_v5 = vld [vmem:[%s2189_s3] sm:$0xff]  ;;  %v67_v6 = vld [vmem:[%s2189_s3 + $0x8] sm:$0xff]  ;;  %v51_v7 = vadd.s32 50, %v49_v2  ;;  %v50_v8 = vadd.s32 50, %v48_v4  ;;  %v1635_v12 = vpack.c.bf16 %v69_v11, %v68_v10  ;;  %1655 = vmatprep.subr.bf16.mxu1 %v1802_v15  ;;  %v72_v19 = vld [vmem:[%s2189_s3 + $0x30] sm:$0xff] }
   0x4   :  { %v1631_v9 = vpack.c.bf16 %v67_v6, %v66_v5  ;;  %v70_v13 = vld [vmem:[%s2189_s3 + $0x20] sm:$0xff]  ;;  %v71_v14 = vld [vmem:[%s2189_s3 + $0x28] sm:$0xff] }
   0x5   :  { %v198_v16 = vld [vmem:[%s2191_s5] sm:$0xff]  ;;  %v199_v17 = vld [vmem:[%s2191_s5 + $0x8] sm:$0xff]  ;;  %v1639_v18 = vpack.c.bf16 %v71_v14, %v70_v13 }
   0x6   :  { %1632 = vmatprep.subr.bf16.mxu0 %v1631_v9  ;;  %56 = vperm.xlu1 %1744, %v51_v7   ;;  %v1916_v20 = vpack.c.bf16 %v199_v17, %v198_v16 }
   0x7   :  { %1634 = vmatpush3.bf16.msra.mxu0 %v1631_v9  ;;  %53 = vperm.xlu0 %1743, %v50_v8  }
   0x8   :  { %15 = vsyncpa [#allocation4], 0  ;;  %1636 = vmatprep.subr.bf16.mxu0 %v1635_v12  ;;  %v73_v21 = vld [vmem:[%s2189_s3 + $0x38] sm:$0xff]  ;;  %v200_v22 = vld [vmem:[%s2191_s5 + $0x10] sm:$0xff]  ;;  %1657 = vmatpush3.bf16.msra.mxu1 %v1916_v20  ;;  %vm1803_vm0 = vmmov 0   ;;  %v1804_v28 = vmov 0.0   ;;  %v36_v34 = vlaneseq }
   0x9   :  { %v201_v23 = vld [vmem:[%s2191_s5 + $0x18] sm:$0xff]  ;;  %1658 = vmatprep.subr.bf16.mxu1 %v1802_v15  ;;  %v1643_v25 = vpack.c.bf16 %v73_v21, %v72_v19  ;;  %v74_v26 = vld [vmem:[%s2189_s3 + $0x40] sm:$0xff]  ;;  %v75_v27 = vld [vmem:[%s2189_s3 + $0x48] sm:$0xff]  ;;  %1522 = vmatprep.mubr.msk.f32.mxu1 %vm1803_vm0, %v1804_v28  ;;  %vm93_vm1 = vcmask 1043456   ;;  %vm86_vm7 = vcmask 818176   ;;  %v1805_v49 = vmov 0.5  }
   0xa   :  { %v1928_v24 = vpack.c.bf16 %v201_v23, %v200_v22  ;;  %v1647_v29 = vpack.c.bf16 %v75_v27, %v74_v26  ;;  %v76_v30 = vld [vmem:[%s2189_s3 + $0x50] sm:$0xff]  ;;  %v77_v31 = vld [vmem:[%s2189_s3 + $0x58] sm:$0xff]  ;;  %v78_v33 = vld [vmem:[%s2189_s3 + $0x60] sm:$0xf]  ;;  %v1958_v37 = vand.u32 127, %v36_v34  ;;  %s1807_s11 = smov 32  }
   0xb   :  { %1638 = vmatpush3.bf16.msra.mxu0 %v1635_v12  ;;  %v1651_v32 = vpack.c.bf16 %v77_v31, %v76_v30  ;;  %v1396_v44 = vld [vmem:[%s2190_s4] ss:$0 sm:$0xff]  ;;  %s1806_s4 = smov 64   ;;  %s1808_s14 = smov 96   ;;  %v1809_v1 = vmov 7   ;;  %vm308_vm14 = vcmask 254976  }
   0xc   :  { %1640 = vmatprep.subr.bf16.mxu0 %v1639_v18  ;;  %1660 = vmatpush3.bf16.msra.mxu1 %v1928_v24  ;;  %vm193_vm9 = vcmp.ge.s32.totalorder %v1958_v37, 64  ;;  %vm194_vm10 = vcmp.lt.s32.totalorder %v1958_v37, 96  ;;  %v181_v59 = vld [vmem:[%s2186_s0] sm:$0x3]  ;;  %vm172_vm12 = vcmp.lt.s32.totalorder %v1958_v37, 16  ;;  %vm202_vm15 = vcmask 261120  }
   0xd   :  { %1661 = vmatprep.subr.bf16.mxu1 %v1802_v15  ;;  %vm195_vm11 = vmand %vm193_vm9, %vm194_vm10  ;;  %v173_v2 = vsel %vm172_vm12, 0, %v1809_v1  ;;  %s1816_s30 = smov [#allocation3]  }
   0xe   :  { %v1981_v50 = vsel %vm195_vm11, 1.0, %v1805_v49  ;;  %v1985_v54 = vsel %vm195_vm11, 0.0, %v1805_v49 }
   0xf   :  { %1642 = vmatpush3.bf16.msra.mxu0 %v1639_v18  ;;  %1523 = vmatmul.mubr.f32.vlgmr.msra.gmra.mrb[0].mxu1 %v1804_v28 }
  0x10   :  { %1644 = vmatprep.subr.bf16.mxu0 %v1643_v25  ;;  %1663 = vmatpush3.bf16.msra.mxu1 %v1916_v20 }
  0x11   :  { %1533 = vmatprep.mubr.msk.f32.mxu1 %vm1803_vm0, %v1804_v28  ;;  %1664 = vmatprep.subr.bf16.mxu1 %v1802_v15 }
  0x13   :  { %1646 = vmatpush3.bf16.msra.mxu0 %v1643_v25 }
  0x14   :  { %1648 = vmatprep.subr.bf16.mxu0 %v1647_v29  ;;  %1666 = vmatpush3.bf16.msra.mxu1 %v1928_v24 }
  0x15   :  { %1667 = vmatprep.subr.bf16.mxu1 %v1802_v15 }
  0x17   :  { %1650 = vmatpush3.bf16.msra.mxu0 %v1647_v29 }
  0x18   :  { %1652 = vmatprep.subr.bf16.mxu0 %v1651_v32 }
  0x1b   :  { %1654 = vmatpush3.bf16.msra.mxu0 %v1651_v32 }
  0x1c   :  { %1509 = vmatprep.subr.msk.mxu0 %vm93_vm1, %v78_v33 }
  0x1f   :  { %1510 = vmatpush3.msk.msra.mxu0 %vm93_vm1, %v78_v33  ;;  %v1810_v33 = vmov 6  }
  0x20   :  { %1679 = vmatprep.subr.bf16.mxu0 %v1802_v15  ;;  %v174_v34 = vsel %vm172_vm12, 1, %v1810_v33  ;;  %v1812_v33 = vmov 4  }
  0x81   :  { %v45_v35 = vpop.permute.xlu1 %44  ;;  %v42_v36 = vpop.permute.xlu0 %41 }
  0x82   :  { %vm47_vm2 = vcmp.eq.s32.totalorder %v1958_v37, %v45_v35  ;;  %vm46_vm5 = vcmp.eq.s32.totalorder %v1958_v37, %v42_v36 }
  0x85   :  { %v57_v38 = vpop.permute.xlu1 %56 }
  0x86   :  { %v54_v39 = vpop.permute.xlu0 %53  ;;  %vm59_vm3 = vcmp.eq.s32.totalorder %v1958_v37, %v57_v38 }
  0x87   :  { %vm58_vm4 = vcmp.eq.s32.totalorder %v1958_v37, %v54_v39  ;;  %vm61_vm6 = vmor %vm47_vm2, %vm59_vm3 }
  0x88   :  { %v1395_v40 = vsel %vm61_vm6, 1.0, %v1804_v28  ;;  %vm60_vm8 = vmor %vm46_vm5, %vm58_vm4 }
  0x89   :  { %v1394_v41 = vsel %vm60_vm8, 1.0, %v1804_v28  ;;  %vm1375_vm8 = vcmask 64512  }
  0x8a   :  { %1511 = vmatprep.mubr.msk.f32.mxu0 %vm86_vm7, %v1394_v41 }
  0x8b   :  { %1512 = vmatmul.mubr.msk.f32.vlgmr.msra.gmra.mrb[0].mxu0 %vm86_vm7, %v1395_v40  ;;  %vm1209_vm7 = vcmask 130048  }
  0x8c   :  { %1681 = vmatpush3.bf16.msra.mxu0 %v1916_v20  ;;  %1566 = vmatprep.mubr.msk.f32.mxu0 %vm1803_vm0, %v1804_v28 }
  0x8d   :  { %1682 = vmatprep.subr.bf16.mxu0 %v1802_v15 }
  0x90   :  { %1684 = vmatpush3.bf16.msra.mxu0 %v1928_v24 }
  0x91   :  { %1691 = vmatprep.subr.bf16.mxu0 %v1802_v15 }
  0xe2   :  { %v272_v42 = vpop.f32.mrb[0].mxu1 }
  0xe3   :  { %v1524_v43 = vpop.f32.mrb[1].mxu1 }
 0x15e   :  { %v1513_v45 = vpop.f32.mrb[0].mxu0 }
 0x15f   :  { %v1977_v46 = vadd.f32 %v1513_v45, %v1396_v44  ;;  %v163_v47 = vpop.f32.mrb[1].mxu0 }
 0x160   :  { %v1979_v48 = vadd.f32 %v1396_v44, %v163_v47 }
 0x162   :  { %v276_v51 = vadd.f32 %v272_v42, %v1979_v48 }
 0x164   :  { %v277_v52 = vmul.f32 %v276_v51, %v1981_v50 }
 0x166   :  { %1745 = vtanh.f32 %v277_v52 }
 0x170   :  { %v1746_v53 = vpop.eup %1745 }
 0x171   :  { %v279_v55 = vmul.f32 %v1746_v53, %v1981_v50 }
 0x173   :  { %v280_v56 = vadd.f32 %v279_v55, %v1985_v54 }
 0x175   :  { %283 = vrot.lane.b32.xlu0 %v280_v56, %s1806_s4  ;;  %v281_v60 = vmul.f32 0.0, %v280_v56 }
 0x1e7   :  { %v284_v57 = vpop.permute.xlu0 %283 }
 0x1e8   :  { %v286_v58 = vmul.f32 %v284_v57, %v280_v56 }
 0x1ea   :  { %288 = vrot.lane.b32.xlu1 %v286_v58, %s1807_s11 }
 0x1ee   :  { %183 = vperm.xlu1 %1744, %v181_v59  }
 0x25c   :  { %v289_v61 = vpop.permute.xlu1 %288 }
 0x25d   :  { %v291_v62 = vadd.f32 %v289_v61, %v281_v60 }
 0x25f   :  { %1747 = vtanh.f32 %v291_v62  ;;  %299 = vrot.lane.b32.xlu1 %v291_v62, %s1808_s14 }
 0x269   :  { %v1748_v63 = vpop.eup %1747 }
 0x26a   :  { %294 = vrot.lane.b32.xlu0 %v1748_v63, %s1806_s4 }
 0x26d   :  { %v1997_v0 = vpop.permute.xlu1 %183 }
 0x26e   :  { %vm185_vm13 = vcmp.lt.s32.totalorder %v173_v2, %v1997_v0  ;;  %vm186_vm1 = vcmp.lt.s32.totalorder %v174_v34, %v1997_v0  ;;  %v1811_v2 = vmov 5   ;;  %v176_v34 = vsel %vm172_vm12, 3, %v1812_v33 }
 0x26f   :  { %vm188_vm3 = vcmp.lt.s32.totalorder %v176_v34, %v1997_v0 }
 0x2d1   :  { %v300_v4 = vpop.permute.xlu1 %299 }
 0x2d2   :  { %v302_v5 = vsel %vm185_vm13, %v300_v4, 0.0  ;;  %v175_v4 = vsel %vm172_vm12, 2, %v1811_v2 }
 0x2d3   :  { %v392_v6 = vrot.slane %v302_v5, 6  ;;  %vm187_vm2 = vcmp.lt.s32.totalorder %v175_v4, %v1997_v0 }
 0x2d5   :  { %393 = vrot.lane.b32.xlu1 %v392_v6, %s1807_s11 }
 0x2dc   :  { %v295_v7 = vpop.permute.xlu0 %294 }
 0x2dd   :  { %v297_v8 = vmul.f32 %v295_v7, %v280_v56 }
 0x2df   :  { %304 = vrot.lane.b32.xlu0 %v297_v8, %s1807_s11 }
 0x347   :  { %v394_v23 = vpop.permute.xlu1 %393 }
 0x351   :  { %v305_v9 = vpop.permute.xlu0 %304 }
 0x352   :  { %v307_v10 = vsel %vm185_vm13, %v305_v9, 0.0 }
 0x353   :  { %309 = vst.msk [vmem:[#allocation2] sm:$0x3] %vm308_vm14, %v307_v10  ;;  %1534 = vmatmul.mubr.msk.f32.vlgmr.msra.gmra.mrb[2].mxu1 %vm202_vm15, %v307_v10 }
 0x354   :  { %1669 = vmatpush3.bf16.msra.mxu1 %v1916_v20  ;;  %1544 = vmatprep.mubr.msk.f32.mxu1 %vm1803_vm0, %v1804_v28 }
 0x355   :  { %1670 = vmatprep.subr.bf16.mxu1 %v1802_v15 }
 0x358   :  { %1672 = vmatpush3.bf16.msra.mxu1 %v1928_v24 }
 0x359   :  { %1673 = vmatprep.subr.bf16.mxu1 %v1802_v15 }
 0x426   :  { %v379_v11 = vpop.f32.mrb[2].mxu1 }
 0x427   :  { %v384_v12 = vrot.slane %v379_v11, 6  ;;  %v1535_v13 = vpop.f32.mrb[3].mxu1 }
 0x429   :  { %v386_v14 = vadd.f32 %v384_v12, %v1979_v48 }
 0x42b   :  { %v387_v16 = vmul.f32 %v386_v14, %v1981_v50 }
 0x42d   :  { %1749 = vtanh.f32 %v387_v16 }
 0x437   :  { %v1750_v17 = vpop.eup %1749 }
 0x438   :  { %v389_v18 = vmul.f32 %v1750_v17, %v1981_v50 }
 0x43a   :  { %v390_v19 = vadd.f32 %v389_v18, %v1985_v54 }
 0x43c   :  { %398 = vrot.lane.b32.xlu0 %v390_v19, %s1806_s4  ;;  %v396_v25 = vmul.f32 %v394_v23, %v390_v19 }
 0x4ae   :  { %v399_v21 = vpop.permute.xlu0 %398 }
 0x4af   :  { %v401_v22 = vmul.f32 %v399_v21, %v390_v19 }
 0x4b1   :  { %403 = vrot.lane.b32.xlu0 %v401_v22, %s1807_s11 }
 0x523   :  { %v404_v26 = vpop.permute.xlu0 %403 }
 0x524   :  { %v406_v27 = vadd.f32 %v404_v26, %v396_v25 }
 0x526   :  { %1751 = vtanh.f32 %v406_v27  ;;  %v414_v30 = vrot.slane %v406_v27, 2 }
 0x530   :  { %v1752_v29 = vpop.eup %1751 }
 0x531   :  { %409 = vrot.lane.b32.xlu1 %v1752_v29, %s1806_s4 }
 0x535   :  { %415 = vrot.lane.b32.xlu1 %v414_v30, %s1808_s14 }
 0x5a3   :  { %v410_v31 = vpop.permute.xlu1 %409 }
 0x5a4   :  { %v412_v32 = vmul.f32 %v410_v31, %v390_v19 }
 0x5a6   :  { %v420_v35 = vrot.slane %v412_v32, 2 }
 0x5a7   :  { %v416_v36 = vpop.permute.xlu1 %415 }
 0x5a8   :  { %v418_v38 = vsel %vm186_vm1, %v416_v36, %v302_v5  ;;  %421 = vrot.lane.b32.xlu0 %v420_v35, %s1807_s11 }
 0x5a9   :  { %v509_v39 = vrot.slane %v418_v38, 4 }
 0x5ab   :  { %510 = vrot.lane.b32.xlu1 %v509_v39, %s1807_s11 }
 0x61a   :  { %v422_v40 = vpop.permute.xlu0 %421 }
 0x61b   :  { %v424_v41 = vsel %vm186_vm1, %v422_v40, %v307_v10  ;;  %v425_v42 = vsel %vm186_vm1, %v422_v40, 0.0 }
 0x61c   :  { %426 = vst.msk [vmem:[#allocation2 + $0x2] sm:$0x3] %vm308_vm14, %v425_v42  ;;  %1545 = vmatmul.mubr.msk.f32.vlgmr.msra.gmra.mrb[4].mxu1 %vm202_vm15, %v424_v41 }
 0x61d   :  { %1675 = vmatpush3.bf16.msra.mxu1 %v1916_v20  ;;  %1555 = vmatprep.mubr.msk.f32.mxu1 %vm1803_vm0, %v1804_v28  ;;  %v511_v57 = vpop.permute.xlu1 %510 }
 0x61e   :  { %1676 = vmatprep.subr.bf16.mxu1 %v1802_v15 }
 0x621   :  { %1678 = vmatpush3.bf16.msra.mxu1 %v1928_v24 }
 0x622   :  { %1685 = vmatprep.subr.bf16.mxu1 %v1802_v15 }
 0x6ef   :  { %v496_v43 = vpop.f32.mrb[4].mxu1 }
 0x6f0   :  { %v501_v44 = vrot.slane %v496_v43, 4  ;;  %v1546_v45 = vpop.f32.mrb[5].mxu1 }
 0x6f2   :  { %v503_v47 = vadd.f32 %v501_v44, %v1979_v48 }
 0x6f4   :  { %v504_v49 = vmul.f32 %v503_v47, %v1981_v50 }
 0x6f6   :  { %1753 = vtanh.f32 %v504_v49 }
 0x700   :  { %v1754_v51 = vpop.eup %1753 }
 0x701   :  { %v506_v52 = vmul.f32 %v1754_v51, %v1981_v50 }
 0x703   :  { %v507_v53 = vadd.f32 %v506_v52, %v1985_v54 }
 0x705   :  { %515 = vrot.lane.b32.xlu0 %v507_v53, %s1806_s4  ;;  %v513_v58 = vmul.f32 %v511_v57, %v507_v53 }
 0x777   :  { %v516_v55 = vpop.permute.xlu0 %515 }
 0x778   :  { %v518_v56 = vmul.f32 %v516_v55, %v507_v53 }
 0x77a   :  { %520 = vrot.lane.b32.xlu0 %v518_v56, %s1807_s11 }
 0x7ec   :  { %v521_v59 = vpop.permute.xlu0 %520 }
 0x7ed   :  { %v523_v60 = vadd.f32 %v521_v59, %v513_v58 }
 0x7ef   :  { %1755 = vtanh.f32 %v523_v60  ;;  %v531_v62 = vrot.slane %v523_v60, 4 }
 0x7f9   :  { %v1756_v61 = vpop.eup %1755 }
 0x7fa   :  { %526 = vrot.lane.b32.xlu1 %v1756_v61, %s1806_s4 }
 0x7fe   :  { %532 = vrot.lane.b32.xlu1 %v531_v62, %s1808_s14  ;;  %v1813_v62 = vmov 3  }
 0x86c   :  { %v527_v63 = vpop.permute.xlu1 %526 }
 0x86d   :  { %v529_v1 = vmul.f32 %v527_v63, %v507_v53  ;;  %v177_v63 = vsel %vm172_vm12, 4, %v1813_v62 }
 0x86e   :  { %vm189_vm4 = vcmp.lt.s32.totalorder %v177_v63, %v1997_v0 }
 0x86f   :  { %v537_v5 = vrot.slane %v529_v1, 4 }
 0x870   :  { %v533_v6 = vpop.permute.xlu1 %532 }
 0x871   :  { %v535_v7 = vsel %vm187_vm2, %v533_v6, %v418_v38  ;;  %538 = vrot.lane.b32.xlu0 %v537_v5, %s1807_s11 }
 0x872   :  { %v626_v8 = vrot.slane %v535_v7, 2 }
 0x874   :  { %627 = vrot.lane.b32.xlu1 %v626_v8, %s1807_s11 }
 0x8e3   :  { %v539_v9 = vpop.permute.xlu0 %538 }
 0x8e4   :  { %v541_v10 = vsel %vm187_vm2, %v539_v9, %v424_v41  ;;  %v542_v11 = vsel %vm187_vm2, %v539_v9, 0.0 }
 0x8e5   :  { %543 = vst.msk [vmem:[#allocation2 + $0x4] sm:$0x3] %vm308_vm14, %v542_v11  ;;  %1556 = vmatmul.mubr.msk.f32.vlgmr.msra.gmra.mrb[6].mxu1 %vm202_vm15, %v541_v10 }
 0x8e6   :  { %1687 = vmatpush3.bf16.msra.mxu1 %v1916_v20  ;;  %1577 = vmatprep.mubr.msk.f32.mxu1 %vm1803_vm0, %v1804_v28  ;;  %v628_v25 = vpop.permute.xlu1 %627 }
 0x8e7   :  { %1688 = vmatprep.subr.bf16.mxu1 %v1802_v15 }
 0x8ea   :  { %1690 = vmatpush3.bf16.msra.mxu1 %v1928_v24 }
 0x8eb   :  { %1697 = vmatprep.subr.bf16.mxu1 %v1802_v15 }
 0x9b8   :  { %v613_v12 = vpop.f32.mrb[6].mxu1 }
 0x9b9   :  { %v618_v13 = vrot.slane %v613_v12, 2  ;;  %v1557_v14 = vpop.f32.mrb[7].mxu1 }
 0x9bb   :  { %v620_v16 = vadd.f32 %v618_v13, %v1979_v48 }
 0x9bd   :  { %v621_v17 = vmul.f32 %v620_v16, %v1981_v50 }
 0x9bf   :  { %1757 = vtanh.f32 %v621_v17 }
 0x9c9   :  { %v1758_v18 = vpop.eup %1757 }
 0x9ca   :  { %v623_v19 = vmul.f32 %v1758_v18, %v1981_v50 }
 0x9cc   :  { %v624_v21 = vadd.f32 %v623_v19, %v1985_v54 }
 0x9ce   :  { %632 = vrot.lane.b32.xlu0 %v624_v21, %s1806_s4  ;;  %v630_v26 = vmul.f32 %v628_v25, %v624_v21  ;;  %v1814_v25 = vmov 2  }
 0xa40   :  { %v633_v22 = vpop.permute.xlu0 %632 }
 0xa41   :  { %v635_v23 = vmul.f32 %v633_v22, %v624_v21 }
 0xa43   :  { %637 = vrot.lane.b32.xlu0 %v635_v23, %s1807_s11 }
 0xab5   :  { %v638_v27 = vpop.permute.xlu0 %637 }
 0xab6   :  { %v640_v29 = vadd.f32 %v638_v27, %v630_v26  ;;  %v178_v26 = vsel %vm172_vm12, 5, %v1814_v25 }
 0xab8   :  { %1759 = vtanh.f32 %v640_v29  ;;  %v648_v30 = vrot.slane %v640_v29, 6 }
 0xac2   :  { %v1760_v48 = vpop.eup %1759 }
 0xac3   :  { %643 = vrot.lane.b32.xlu1 %v1760_v48, %s1806_s4 }
 0xac7   :  { %649 = vrot.lane.b32.xlu1 %v648_v30, %s1808_s14 }
 0xb35   :  { %v644_v31 = vpop.permute.xlu1 %643 }
 0xb36   :  { %v646_v32 = vmul.f32 %v644_v31, %v624_v21 }
 0xb38   :  { %v654_v35 = vrot.slane %v646_v32, 6 }
 0xb39   :  { %v650_v36 = vpop.permute.xlu1 %649 }
 0xb3a   :  { %655 = vrot.lane.b32.xlu0 %v654_v35, %s1807_s11  ;;  %v652_v38 = vsel %vm188_vm3, %v650_v36, %v535_v7 }
 0xb3b   :  { %740 = vrot.lane.b32.xlu1 %v652_v38, %s1807_s11 }
 0xbac   :  { %v656_v39 = vpop.permute.xlu0 %655 }
 0xbad   :  { %v658_v40 = vsel %vm188_vm3, %v656_v39, %v541_v10  ;;  %v659_v41 = vsel %vm188_vm3, %v656_v39, 0.0  ;;  %v741_v55 = vpop.permute.xlu1 %740 }
 0xbae   :  { %660 = vst.msk [vmem:[#allocation2 + $0x6] sm:$0x3] %vm308_vm14, %v659_v41  ;;  %1567 = vmatmul.mubr.msk.f32.vlgmr.msra.gmra.mrb[2].mxu0 %vm202_vm15, %v658_v40 }
 0xbaf   :  { %1693 = vmatpush3.bf16.msra.mxu0 %v1916_v20  ;;  %1588 = vmatprep.mubr.msk.f32.mxu0 %vm1803_vm0, %v1804_v28 }
 0xbb0   :  { %1694 = vmatprep.subr.bf16.mxu0 %v1802_v15 }
 0xbb3   :  { %1696 = vmatpush3.bf16.msra.mxu0 %v1928_v24 }
 0xbb5   :  { %v1116_v34 = vld [vmem:[#allocation2] sm:$0xff] }
 0xc81   :  { %v730_v42 = vpop.f32.mrb[2].mxu0 }
 0xc82   :  { %v734_v43 = vadd.f32 %v730_v42, %v1977_v46  ;;  %v1568_v44 = vpop.f32.mrb[3].mxu0 }
 0xc84   :  { %v735_v45 = vmul.f32 %v734_v43, %v1981_v50 }
 0xc86   :  { %1761 = vtanh.f32 %v735_v45 }
 0xc90   :  { %v1762_v47 = vpop.eup %1761 }
 0xc91   :  { %v737_v49 = vmul.f32 %v1762_v47, %v1981_v50 }
 0xc93   :  { %v738_v51 = vadd.f32 %v737_v49, %v1985_v54 }
 0xc95   :  { %745 = vrot.lane.b32.xlu0 %v738_v51, %s1806_s4  ;;  %v743_v56 = vmul.f32 %v741_v55, %v738_v51 }
 0xd07   :  { %v746_v52 = vpop.permute.xlu0 %745 }
 0xd08   :  { %v748_v53 = vmul.f32 %v746_v52, %v738_v51 }
 0xd0a   :  { %750 = vrot.lane.b32.xlu0 %v748_v53, %s1807_s11 }
 0xd7c   :  { %v751_v57 = vpop.permute.xlu0 %750 }
 0xd7d   :  { %v753_v58 = vadd.f32 %v751_v57, %v743_v56 }
 0xd7f   :  { %1763 = vtanh.f32 %v753_v58 }
 0xd89   :  { %v1764_v59 = vpop.eup %1763 }
 0xd8a   :  { %756 = vrot.lane.b32.xlu1 %v1764_v59, %s1806_s4 }
 0xd8e   :  { %761 = vrot.lane.b32.xlu1 %v753_v58, %s1808_s14  ;;  %v1815_v58 = vmov 1  }
 0xd8f   :  { %v179_v59 = vsel %vm172_vm12, 6, %v1815_v58 }
 0xd90   :  { %vm191_vm5 = vcmp.lt.s32.totalorder %v179_v59, %v1997_v0 }
 0xdfc   :  { %v757_v60 = vpop.permute.xlu1 %756 }
 0xdfd   :  { %v759_v61 = vmul.f32 %v757_v60, %v738_v51 }
 0xdff   :  { %766 = vrot.lane.b32.xlu0 %v759_v61, %s1807_s11 }
 0xe00   :  { %v762_v1 = vpop.permute.xlu1 %761 }
 0xe01   :  { %v764_v2 = vsel %vm189_vm4, %v762_v1, %v652_v38 }
 0xe02   :  { %v854_v4 = vrot.slane %v764_v2, 6 }
 0xe04   :  { %855 = vrot.lane.b32.xlu1 %v854_v4, %s1807_s11 }
 0xe71   :  { %v767_v5 = vpop.permute.xlu0 %766 }
 0xe72   :  { %v769_v6 = vsel %vm189_vm4, %v767_v5, %v658_v40  ;;  %v770_v7 = vsel %vm189_vm4, %v767_v5, 0.0 }
 0xe73   :  { %771 = vst.msk [vmem:[#allocation2 + $0x8] sm:$0x3] %vm308_vm14, %v770_v7  ;;  %1578 = vmatmul.mubr.msk.f32.vlgmr.msra.gmra.mrb[8].mxu1 %vm202_vm15, %v769_v6 }
 0xe74   :  { %1699 = vmatpush3.bf16.msra.mxu1 %v1916_v20  ;;  %1599 = vmatprep.mubr.msk.f32.mxu1 %vm1803_vm0, %v1804_v28  ;;  %vm190_vm0 = vcmp.lt.s32.totalorder %v178_v26, %v1997_v0  ;;  %v1121_v26 = vld [vmem:[%s2192_s6 + $0x18] sm:$0xff] }
 0xe75   :  { %1700 = vmatprep.subr.bf16.mxu1 %v1802_v15 }
 0xe76   :  { %v856_v15 = vpop.permute.xlu1 %855 }
 0xe78   :  { %1702 = vmatpush3.bf16.msra.mxu1 %v1928_v24 }
 0xf46   :  { %v841_v8 = vpop.f32.mrb[8].mxu1 }
 0xf47   :  { %v846_v9 = vrot.slane %v841_v8, 6  ;;  %v1579_v10 = vpop.f32.mrb[9].mxu1 }
 0xf49   :  { %v848_v11 = vadd.f32 %v846_v9, %v1977_v46 }
 0xf4b   :  { %v849_v12 = vmul.f32 %v848_v11, %v1981_v50 }
 0xf4d   :  { %1765 = vtanh.f32 %v849_v12 }
 0xf57   :  { %v1766_v13 = vpop.eup %1765 }
 0xf58   :  { %v851_v14 = vmul.f32 %v1766_v13, %v1981_v50 }
 0xf5a   :  { %v852_v20 = vadd.f32 %v851_v14, %v1985_v54 }
 0xf5c   :  { %860 = vrot.lane.b32.xlu0 %v852_v20, %s1806_s4  ;;  %v858_v24 = vmul.f32 %v856_v15, %v852_v20 }
 0xfce   :  { %v861_v28 = vpop.permute.xlu0 %860 }
 0xfcf   :  { %v863_v16 = vmul.f32 %v861_v28, %v852_v20 }
 0xfd1   :  { %865 = vrot.lane.b32.xlu0 %v863_v16, %s1807_s11 }
0x1043   :  { %v866_v17 = vpop.permute.xlu0 %865 }
0x1044   :  { %v868_v18 = vadd.f32 %v866_v17, %v858_v24  ;;  %v1118_v24 = vld [vmem:[%s2192_s6] sm:$0xff] }
0x1046   :  { %1767 = vtanh.f32 %v868_v18  ;;  %v876_v21 = vrot.slane %v868_v18, 2  ;;  %v1119_v18 = vld [vmem:[%s2192_s6 + $0x8] sm:$0xff] }
0x1050   :  { %v1768_v19 = vpop.eup %1767 }
0x1051   :  { %871 = vrot.lane.b32.xlu1 %v1768_v19, %s1806_s4  ;;  %v1715_v19 = vpack.c.bf16 %v1119_v18, %v1118_v24 }
0x1053   :  { %1716 = vmatprep.subr.bf16.mxu1 %v1715_v19 }
0x1055   :  { %877 = vrot.lane.b32.xlu1 %v876_v21, %s1808_s14  ;;  %v1124_v21 = vld [vmem:[%s2193_s7 + $0x10] sm:$0xff] }
0x10c3   :  { %v872_v22 = vpop.permute.xlu1 %871 }
0x10c4   :  { %v874_v23 = vmul.f32 %v872_v22, %v852_v20  ;;  %v1125_v22 = vld [vmem:[%s2193_s7 + $0x18] sm:$0xff] }
0x10c5   :  { %v1707_v25 = vpack.c.bf16 %v1125_v22, %v1124_v21 }
0x10c6   :  { %v882_v27 = vrot.slane %v874_v23, 2  ;;  %v1120_v23 = vld [vmem:[%s2192_s6 + $0x10] sm:$0xff] }
0x10c7   :  { %v878_v29 = vpop.permute.xlu1 %877 }
0x10c8   :  { %v880_v48 = vsel %vm190_vm0, %v878_v29, %v764_v2  ;;  %883 = vrot.lane.b32.xlu0 %v882_v27, %s1807_s11  ;;  %v1719_v27 = vpack.c.bf16 %v1121_v26, %v1120_v23 }
0x10c9   :  { %v971_v30 = vrot.slane %v880_v48, 4 }
0x10cb   :  { %972 = vrot.lane.b32.xlu1 %v971_v30, %s1807_s11 }
0x113a   :  { %v884_v31 = vpop.permute.xlu0 %883 }
0x113b   :  { %v886_v32 = vsel %vm190_vm0, %v884_v31, %v769_v6  ;;  %v887_v33 = vsel %vm190_vm0, %v884_v31, 0.0  ;;  %v180_v31 = vsel %vm172_vm12, 7, %v1801_v3 }
0x113c   :  { %888 = vst.msk [vmem:[#allocation2 + $0xa] sm:$0x3] %vm308_vm14, %v887_v33  ;;  %1589 = vmatmul.mubr.msk.f32.vlgmr.msra.gmra.mrb[4].mxu0 %vm202_vm15, %v886_v32  ;;  %vm192_vm6 = vcmp.lt.s32.totalorder %v180_v31, %v1997_v0 }
0x113d   :  { %1610 = vmatprep.mubr.msk.f32.mxu0 %vm202_vm15, %v1116_v34  ;;  %v973_v47 = vpop.permute.xlu1 %972 }
0x120f   :  { %v958_v35 = vpop.f32.mrb[4].mxu0 }
0x1210   :  { %v963_v36 = vrot.slane %v958_v35, 4  ;;  %v1590_v38 = vpop.f32.mrb[5].mxu0  ;;  %v1207_v35 = vld [vmem:[%s2195_s9] sm:$0xff] }
0x1212   :  { %v965_v39 = vadd.f32 %v963_v36, %v1977_v46 }
0x1214   :  { %v966_v40 = vmul.f32 %v965_v39, %v1981_v50  ;;  %v1208_v39 = vld [vmem:[%s2195_s9 + $0x8] sm:$0xff] }
0x1216   :  { %1769 = vtanh.f32 %v966_v40 }
0x1220   :  { %v1770_v41 = vpop.eup %1769 }
0x1221   :  { %v968_v42 = vmul.f32 %v1770_v41, %v1981_v50  ;;  %v1413_v41 = vld [vmem:[%s2194_s8] ss:$0 sm:$0xff] }
0x1223   :  { %v969_v43 = vadd.f32 %v968_v42, %v1985_v54 }
0x1225   :  { %977 = vrot.lane.b32.xlu0 %v969_v43, %s1806_s4  ;;  %v975_v49 = vmul.f32 %v973_v47, %v969_v43 }
0x1297   :  { %v978_v44 = vpop.permute.xlu0 %977 }
0x1298   :  { %v980_v45 = vmul.f32 %v978_v44, %v969_v43 }
0x129a   :  { %982 = vrot.lane.b32.xlu0 %v980_v45, %s1807_s11 }
0x130c   :  { %v983_v51 = vpop.permute.xlu0 %982 }
0x130d   :  { %v985_v52 = vadd.f32 %v983_v51, %v975_v49 }
0x130f   :  { %1771 = vtanh.f32 %v985_v52  ;;  %v993_v55 = vrot.slane %v985_v52, 4 }
0x1319   :  { %v1772_v53 = vpop.eup %1771 }
0x131a   :  { %988 = vrot.lane.b32.xlu1 %v1772_v53, %s1806_s4 }
0x131e   :  { %994 = vrot.lane.b32.xlu1 %v993_v55, %s1808_s14 }
0x138c   :  { %v989_v56 = vpop.permute.xlu1 %988 }
0x138d   :  { %v991_v57 = vmul.f32 %v989_v56, %v969_v43 }
0x138f   :  { %v999_v60 = vrot.slane %v991_v57, 4 }
0x1390   :  { %v995_v61 = vpop.permute.xlu1 %994 }
0x1391   :  { %v997_v62 = vsel %vm191_vm5, %v995_v61, %v880_v48  ;;  %1000 = vrot.lane.b32.xlu0 %v999_v60, %s1807_s11 }
0x1392   :  { %v1088_v63 = vrot.slane %v997_v62, 2 }
0x1394   :  { %1089 = vrot.lane.b32.xlu1 %v1088_v63, %s1807_s11 }
0x1403   :  { %v1001_v1 = vpop.permute.xlu0 %1000 }
0x1404   :  { %v1003_v2 = vsel %vm191_vm5, %v1001_v1, %v886_v32  ;;  %v1004_v4 = vsel %vm191_vm5, %v1001_v1, 0.0 }
0x1405   :  { %1005 = vst.msk [vmem:[#allocation2 + $0xc] sm:$0x3] %vm308_vm14, %v1004_v4  ;;  %1600 = vmatmul.mubr.msk.f32.vlgmr.msra.gmra.mrb[10].mxu1 %vm202_vm15, %v1003_v2 }
0x1406   :  { %1628 = vmatprep.mubr.msk.f32.mxu1 %vm202_vm15, %v1116_v34  ;;  %v1090_v20 = vpop.permute.xlu1 %1089  ;;  %1718 = vmatpush3.bf16.msra.mxu1 %v1715_v19 }
0x1407   :  { %1720 = vmatprep.subr.bf16.mxu1 %v1719_v27 }
0x140a   :  { %1722 = vmatpush3.bf16.msra.mxu1 %v1719_v27 }
0x14d8   :  { %v1075_v5 = vpop.f32.mrb[10].mxu1 }
0x14d9   :  { %v1080_v6 = vrot.slane %v1075_v5, 2  ;;  %v1601_v7 = vpop.f32.mrb[11].mxu1 }
0x14db   :  { %v1082_v8 = vadd.f32 %v1080_v6, %v1977_v46 }
0x14dd   :  { %v1083_v9 = vmul.f32 %v1082_v8, %v1981_v50 }
0x14df   :  { %1773 = vtanh.f32 %v1083_v9 }
0x14e9   :  { %v1774_v10 = vpop.eup %1773 }
0x14ea   :  { %v1085_v11 = vmul.f32 %v1774_v10, %v1981_v50  ;;  %v1122_v50 = vld [vmem:[%s2193_s7] sm:$0xff] }
0x14ec   :  { %v1086_v12 = vadd.f32 %v1085_v11, %v1985_v54  ;;  %v1123_v54 = vld [vmem:[%s2193_s7 + $0x8] sm:$0xff] }
0x14ed   :  { %v1703_v17 = vpack.c.bf16 %v1123_v54, %v1122_v50 }
0x14ee   :  { %1094 = vrot.lane.b32.xlu0 %v1086_v12, %s1806_s4  ;;  %v1092_v28 = vmul.f32 %v1090_v20, %v1086_v12 }
0x14ef   :  { %1704 = vmatprep.subr.bf16.mxu0 %v1703_v17 }
0x14f0   :  { %1706 = vmatpush3.bf16.msra.mxu0 %v1703_v17 }
0x14f1   :  { %1708 = vmatprep.subr.bf16.mxu0 %v1707_v25 }
0x14f4   :  { %1710 = vmatpush3.bf16.msra.mxu0 %v1707_v25 }
0x1560   :  { %v1095_v13 = vpop.permute.xlu0 %1094 }
0x1561   :  { %v1097_v14 = vmul.f32 %v1095_v13, %v1086_v12 }
0x1563   :  { %1099 = vrot.lane.b32.xlu0 %v1097_v14, %s1807_s11 }
0x15d5   :  { %v1100_v16 = vpop.permute.xlu0 %1099 }
0x15d6   :  { %v1102_v15 = vadd.f32 %v1100_v16, %v1092_v28 }
0x15d8   :  { %1775 = vtanh.f32 %v1102_v15 }
0x15e2   :  { %v1776_v46 = vpop.eup %1775 }
0x15e3   :  { %1105 = vrot.lane.b32.xlu1 %v1776_v46, %s1806_s4  ;;  %s1383_s4 = sshll.u32 %s1816_s30, 4  ;;  %s1384_s4 = int_to_ptr.vmem [resolvable:$true] %s1383_s4 }
0x15e4   :  { %p1782_p1 = scmp.lt.s32.totalorder %s1384_s4, %s1384_s4 }
0x1655   :  { %v1106_v29 = vpop.permute.xlu1 %1105 }
0x1656   :  { %v1108_v48 = vmul.f32 %v1106_v29, %v1086_v12 }
0x1658   :  { %v1110_v30 = vrot.slane %v1108_v48, 6 }
0x165a   :  { %1111 = vrot.lane.b32.xlu0 %v1110_v30, %s1807_s11  ;;  %s1777_s11 = scalar_lea.vmem %s1384_s4, 256 }
0x165b   :  { %p1778_p0 = scmp.ne.s32.totalorder %s1384_s4, %s1777_s11  ;;  %p1783_p2 = scmp.lt.s32.totalorder %s1777_s11, %s1777_s11 }
0x165d   :  { %p1784_p3 = por %p1783_p2, %p1782_p1 }
0x165f   :  { %p1785_p4 = pnand %p1784_p3, %p1778_p0 }
0x16cc   :  { %v1112_v32 = vpop.permute.xlu0 %1111 }
0x16cd   :  { %v1114_v33 = vsel %vm192_vm6, %v1112_v32, 0.0 }
0x16ce   :  { %1115 = vst.msk [vmem:[#allocation2 + $0xe] sm:$0x3] %vm308_vm14, %v1114_v33 }
0x16d5   :  { %v1117_v34 = vld [vmem:[#allocation2 + $0x8] sm:$0xff] }
0x16d6   :  { %1611 = vmatmul.mubr.msk.f32.vlgmr.msra.gmra.mrb[6].mxu0 %vm202_vm15, %v1117_v34  ;;  %1629 = vmatmul.mubr.msk.f32.vlgmr.msra.gmra.mrb[12].mxu1 %vm202_vm15, %v1117_v34 }
0x16d7   :  { %1617 = vmatprep.mubr.msk.f32.mxu0 %vm1209_vm7, %v1207_v35 }
0x17a9   :  { %v1612_v36 = vpop.f32.mrb[6].mxu0  ;;  %v1630_v37 = vpop.f32.mrb[12].mxu1 }
0x17aa   :  { %v1198_v3 = vpop.f32.mrb[7].mxu0  ;;  %v1357_v38 = vpop.f32.mrb[13].mxu1 }
0x17ab   :  { %v1711_v0 = vpack.c.bf16 %v1612_v36, %v1198_v3 }
0x17ad   :  { %1712 = vmatprep.subr.bf16.mxu0 %v1711_v0 }
0x17ae   :  { %1714 = vmatpush3.bf16.msra.mxu0 %v1711_v0 }
0x17b1   :  { %1618 = vmatmul.mubr.msk.f32.vlgmr.msra.gmra.mrb[8].mxu0 %vm1209_vm7, %v1208_v39 }
0x1884   :  { %v1619_v40 = vpop.f32.mrb[8].mxu0 }
0x1885   :  { %v1363_v42 = vadd.f32 %v1630_v37, %v1619_v40  ;;  %v1282_v43 = vpop.f32.mrb[9].mxu0 }
0x1886   :  { %v1358_v44 = vadd.f32 %v1357_v38, %v1282_v43 }
0x1887   :  { %v1374_v45 = vadd.f32 %v1413_v41, %v1363_v42 }
0x1888   :  { %v1373_v47 = vadd.f32 %v1413_v41, %v1358_v44 }
0x1889   :  { %1377 = vst.msk [vmem:[#allocation3 + $0x8] sm:$0xff] %vm1375_vm8, %v1374_v45 }
0x188a   :  { %1376 = vst.msk [vmem:[#allocation3] sm:$0xff] %vm1375_vm8, %v1373_v47 }
0x188b   :  { %1788 = shalt.err (!%p1785_p4)
}
0x188c   :  { %s1789_s12 = scalar_lea.hbm %s2196_s10, 256 }
0x188d   :  { %p1790_p5 = scmp.ne.s32.totalorder %s2196_s10, %s1789_s12  ;;  %p1793_p6 = scmp.lt.u32.totalorder %s1789_s12, %s2196_s10 }
0x188f   :  { %p1795_p7 = pnand %p1793_p6, %p1790_p5 }
0x1891   :  { %1798 = shalt.err (!%p1795_p7)
}
0x1892   :  { %s1817_s16 = smov 128   ;;  %s1818_s17 = smov 8  }
0x1893   :  { %1389 = dma.vmem_to_hbm [thread:$0]  %s1384_s4, 256, %s2196_s10, [#allocation4], %s1817_s16, %s1817_s16, %s1818_s17  }
0x1894   :  { %1799 = dma.done.wait [#allocation4], 256  }
0x1895   :  { %1800 = vsyncadd [#allocation4], 4294967040 }
0x1896   :  { %1393 = vsyncpa [#allocation4], 1 }

</bundles_post_ra>
